<compile_context>
chip_gen: v5e
topology: v5e:2x2
jax: 0.10.0
libtpu: 0.0.40
codegen_flags: <defaults>
</compile_context>

<pallas_src>
import functools

import jax
import jax.numpy as jnp
from jax.experimental import pallas as pl
from jax.experimental.pallas import tpu as pltpu


def _round_up(x, m):
    return ((x + m - 1) // m) * m


# ---------------------------------------------------------------------------
# Fully fused single-call kernel (small graphs: everything resident in VMEM).
# out = A_hat @ relu(A_hat @ (X @ W1) + b1) @ W2 + b2
# ---------------------------------------------------------------------------
def _fused_gcn_kernel(a_ref, x_ref, w1_ref, b1_ref, w2_ref, b2_ref, o_ref):
    a = a_ref[...]                                             # bf16 (n, n)
    xw1 = jnp.dot(x_ref[...], w1_ref[...],
                  preferred_element_type=jnp.float32)          # (n, h) f32
    h = jnp.dot(a, xw1.astype(jnp.bfloat16),
                preferred_element_type=jnp.float32)
    h = jnp.maximum(h + b1_ref[...], 0.0)                      # bias + ReLU
    hw2 = jnp.dot(h.astype(jnp.bfloat16), w2_ref[...],
                  preferred_element_type=jnp.float32)          # (n, o) f32
    out = jnp.dot(a, hw2.astype(jnp.bfloat16),
                  preferred_element_type=jnp.float32) + b2_ref[...]
    o_ref[...] = out


def gcn_forward_fused(a_hat, x, w1, b1, w2, b2):
    """One pallas_call, all operands VMEM-resident. For padded N <= ~1K."""
    n, f_in = x.shape
    hidden = w1.shape[1]
    out_ch = w2.shape[1]

    n_pad = _round_up(n, 128)        # lane/layout minimum, NOT the tile size
    f_pad = _round_up(f_in, 128)
    h_pad = _round_up(hidden, 128)
    o_pad = _round_up(out_ch, 128)

    a_bf = jnp.zeros((n_pad, n_pad), jnp.bfloat16).at[:n, :n].set(
        a_hat.astype(jnp.bfloat16))
    x_bf = jnp.zeros((n_pad, f_pad), jnp.bfloat16).at[:n, :f_in].set(
        x.astype(jnp.bfloat16))
    w1_bf = jnp.zeros((f_pad, h_pad), jnp.bfloat16).at[:f_in, :hidden].set(
        w1.astype(jnp.bfloat16))
    w2_bf = jnp.zeros((h_pad, o_pad), jnp.bfloat16).at[:hidden, :out_ch].set(
        w2.astype(jnp.bfloat16))
    b1_p = jnp.zeros((1, h_pad), jnp.float32).at[0, :hidden].set(b1)
    b2_p = jnp.zeros((1, o_pad), jnp.float32).at[0, :out_ch].set(b2)

    out_p = pl.pallas_call(
        _fused_gcn_kernel,
        out_shape=jax.ShapeDtypeStruct((n_pad, o_pad), jnp.float32),
        grid=(1,),
        in_specs=[
            pl.BlockSpec((n_pad, n_pad), lambda i: (0, 0)),   # A_hat
            pl.BlockSpec((n_pad, f_pad), lambda i: (0, 0)),   # X
            pl.BlockSpec((f_pad, h_pad), lambda i: (0, 0)),   # W1
            pl.BlockSpec((1, h_pad), lambda i: (0, 0)),       # b1
            pl.BlockSpec((h_pad, o_pad), lambda i: (0, 0)),   # W2
            pl.BlockSpec((1, o_pad), lambda i: (0, 0)),       # b2
        ],
        out_specs=pl.BlockSpec((n_pad, o_pad), lambda i: (0, 0)),
        compiler_params=pltpu.CompilerParams(
            dimension_semantics=("arbitrary",),
            vmem_limit_bytes=32 * 1024 * 1024,
        ),
    )(a_bf, x_bf, w1_bf, b1_p, w2_bf, b2_p)
    return out_p[:n, :out_ch]


# ---------------------------------------------------------------------------
# Tiled path for large graphs (two pallas_calls).
# ---------------------------------------------------------------------------
def _layer1_kernel(a_ref, xw_ref, b1_ref, w2_ref, o_ref, acc_ref):
    """HW2 = relu(A_hat @ XW1 + b1) @ W2   (bf16 output, W2 fused epilogue)."""
    k = pl.program_id(1)

    @pl.when(k == 0)
    def _():
        acc_ref[...] = jnp.zeros_like(acc_ref)

    acc_ref[...] += jnp.dot(a_ref[...], xw_ref[...],
                            preferred_element_type=jnp.float32)

    @pl.when(k == pl.num_programs(1) - 1)
    def _():
        h = jnp.maximum(acc_ref[...] + b1_ref[...], 0.0).astype(jnp.bfloat16)
        o_ref[...] = jnp.dot(h, w2_ref[...],
                             preferred_element_type=jnp.float32
                             ).astype(o_ref.dtype)


def _layer2_kernel(a_ref, hw_ref, b2_ref, o_ref):
    """out = A_hat @ HW2 + b2, accumulating directly in the resident f32 block."""
    k = pl.program_id(1)

    @pl.when(k == 0)
    def _():
        o_ref[...] = jnp.zeros_like(o_ref) + b2_ref[...]   # bias folded into init

    o_ref[...] += jnp.dot(a_ref[...], hw_ref[...],
                          preferred_element_type=jnp.float32)


def gcn_forward_tiled(a_hat, x, w1, b1, w2, b2, *, tile_nodes=512):
    n, f_in = x.shape
    hidden = w1.shape[1]
    out_ch = w2.shape[1]

    # Tile never larger than the (128-aligned) problem -> no 256x padding waste.
    tile = min(_round_up(tile_nodes, 128), _round_up(n, 128))
    n_pad = _round_up(n, tile)
    h_pad = _round_up(hidden, 128)
    o_pad = _round_up(out_ch, 128)
    tm = tk = tile

    a_bf = jnp.zeros((n_pad, n_pad), jnp.bfloat16).at[:n, :n].set(
        a_hat.astype(jnp.bfloat16))
    x_p = jnp.zeros((n_pad, f_in), jnp.float32).at[:n, :].set(x)
    w1_p = jnp.zeros((f_in, h_pad), jnp.float32).at[:, :hidden].set(w1)
    w2_bf = jnp.zeros((h_pad, o_pad), jnp.bfloat16).at[:hidden, :out_ch].set(
        w2.astype(jnp.bfloat16))
    b1_p = jnp.zeros((1, h_pad), jnp.float32).at[0, :hidden].set(b1)
    b2_p = jnp.zeros((1, o_pad), jnp.float32).at[0, :out_ch].set(b2)

    # Tiny projection X@W1 (contraction dim = f_in << MXU width): stays in XLA.
    xw1_bf = jnp.dot(x_p, w1_p,
                     preferred_element_type=jnp.float32).astype(jnp.bfloat16)

    grid = (n_pad // tm, n_pad // tk)
    cparams = pltpu.CompilerParams(
        dimension_semantics=("parallel", "arbitrary"),
        vmem_limit_bytes=32 * 1024 * 1024,   # well under v7x's 64 MiB VMEM
    )

    # Layer 1 (+ fused W2 projection) -> bf16 intermediate (halved writeback).
    hw2_bf = pl.pallas_call(
        _layer1_kernel,
        out_shape=jax.ShapeDtypeStruct((n_pad, o_pad), jnp.bfloat16),
        grid=grid,
        in_specs=[
            pl.BlockSpec((tm, tk), lambda i, k: (i, k)),        # A_hat
            pl.BlockSpec((tk, h_pad), lambda i, k: (k, 0)),     # X @ W1
            pl.BlockSpec((1, h_pad), lambda i, k: (0, 0)),      # b1 (resident)
            pl.BlockSpec((h_pad, o_pad), lambda i, k: (0, 0)),  # W2 (resident)
        ],
        out_specs=pl.BlockSpec((tm, o_pad), lambda i, k: (i, 0)),
        scratch_shapes=[pltpu.VMEM((tm, h_pad), jnp.float32)],
        compiler_params=cparams,
    )(a_bf, xw1_bf, b1_p, w2_bf)

    # Layer 2: out = A_hat @ HW2 + b2.
    out_p = pl.pallas_call(
        _layer2_kernel,
        out_shape=jax.ShapeDtypeStruct((n_pad, o_pad), jnp.float32),
        grid=grid,
        in_specs=[
            pl.BlockSpec((tm, tk), lambda i, k: (i, k)),        # A_hat
            pl.BlockSpec((tk, o_pad), lambda i, k: (k, 0)),     # HW2
            pl.BlockSpec((1, o_pad), lambda i, k: (0, 0)),      # b2 (resident)
        ],
        out_specs=pl.BlockSpec((tm, o_pad), lambda i, k: (i, 0)),
        compiler_params=cparams,
    )(a_bf, hw2_bf, b2_p)

    return out_p[:n, :out_ch]


def gcn_forward(a_hat, x, w1, b1, w2, b2, *, tile_nodes=512, fuse_max_nodes=1024):
    """Dispatch: fully fused single kernel when the problem fits VMEM."""
    if _round_up(x.shape[0], 128) <= fuse_max_nodes:
        return gcn_forward_fused(a_hat, x, w1, b1, w2, b2)
    return gcn_forward_tiled(a_hat, x, w1, b1, w2, b2, tile_nodes=tile_nodes)


# ---------------------------------------------------------------------------
# Host-side helpers (graph normalization, init, reference).
# ---------------------------------------------------------------------------
def build_normalized_adjacency(edge_index, num_nodes):
    """Dense A_hat = D^-1/2 (A + I_remaining) D^-1/2, PyG gcn_norm defaults."""
    src, dst = edge_index[0], edge_index[1]
    a = jnp.zeros((num_nodes, num_nodes), jnp.float32).at[dst, src].add(1.0)
    # add_remaining_self_loops: only fill self-loops for nodes lacking one.
    diag = jnp.diagonal(a)
    a = a + jnp.diag(jnp.where(diag > 0, 0.0, 1.0))
    deg = jnp.sum(a, axis=1)
    deg_inv_sqrt = jnp.where(deg > 0, jax.lax.rsqrt(deg), 0.0)
    return deg_inv_sqrt[:, None] * a * deg_inv_sqrt[None, :]


def glorot(key, shape):
    fan_in, fan_out = shape
    limit = jnp.sqrt(6.0 / (fan_in + fan_out))
    return jax.random.uniform(key, shape, jnp.float32, -limit, limit)


def gcn_reference(a_hat, x, w1, b1, w2, b2):
    h = jnp.maximum(a_hat @ (x @ w1) + b1, 0.0)
    return a_hat @ (h @ w2) + b2


if __name__ == "__main__":
    key = jax.random.PRNGKey(0)
    keys = jax.random.split(key, 8)

    # Small graph matching the module: 16 nodes, 8 in, 32 hidden, 4 out.
    num_nodes, in_channels, hidden_channels, out_channels, num_edges = 16, 8, 32, 4, 40

    x = jax.random.normal(keys[0], (num_nodes, in_channels), jnp.float32)
    edge_index = jax.random.randint(keys[1], (2, num_edges), 0, num_nodes, jnp.int32)

    w1 = glorot(keys[2], (in_channels, hidden_channels))
    b1 = 0.1 * jax.random.normal(keys[3], (hidden_channels,), jnp.float32)
    w2 = glorot(keys[4], (hidden_channels, out_channels))
    b2 = 0.1 * jax.random.normal(keys[5], (out_channels,), jnp.float32)

    a_hat = build_normalized_adjacency(edge_index, num_nodes)

    # --- Path 1: fused single-kernel forward (the actual small workload). ---
    fwd = jax.jit(gcn_forward_fused)
    out = fwd(a_hat, x, w1, b1, w2, b2)
    jax.block_until_ready(out)

    ref = gcn_reference(a_hat, x, w1, b1, w2, b2)
    assert out.shape == (num_nodes, out_channels)
    assert jnp.allclose(out, ref, atol=5e-2, rtol=5e-2), (
        float(jnp.max(jnp.abs(out - ref))))

    # --- Path 2: tiled multi-block path (exercised on a larger graph). ---
    n2, e2 = 500, 3000
    x2 = jax.random.normal(keys[6], (n2, in_channels), jnp.float32)
    edge_index2 = jax.random.randint(keys[7], (2, e2), 0, n2, jnp.int32)
    a_hat2 = build_normalized_adjacency(edge_index2, n2)

    fwd_tiled = jax.jit(functools.partial(gcn_forward_tiled, tile_nodes=256))
    out2 = fwd_tiled(a_hat2, x2, w1, b1, w2, b2)
    jax.block_until_ready(out2)

    ref2 = gcn_reference(a_hat2, x2, w1, b1, w2, b2)
    assert out2.shape == (n2, out_channels)
    assert jnp.allclose(out2, ref2, atol=5e-2, rtol=5e-2), (
        float(jnp.max(jnp.abs(out2 - ref2))))

    print("KERNEL_OK")
</pallas_src>

<mosaic_0001>
module attributes {stable_mosaic.version = 11 : i64} {
  func.func @_fused_gcn_kernel(%arg0: i32, %arg1: memref<128x128xbf16, #tpu.memory_space<vmem>>, %arg2: memref<128x128xbf16, #tpu.memory_space<vmem>>, %arg3: memref<128x128xbf16, #tpu.memory_space<vmem>>, %arg4: memref<1x128xf32, #tpu.memory_space<vmem>>, %arg5: memref<128x128xbf16, #tpu.memory_space<vmem>>, %arg6: memref<1x128xf32, #tpu.memory_space<vmem>>, %arg7: memref<128x128xf32, #tpu.memory_space<vmem>>) attributes {dimension_semantics = [#tpu.dimension_semantics<arbitrary>], iteration_bounds = array<i64: 1>, scalar_prefetch = 0 : i64, scratch_operands = 0 : i64, tpu.core_type = #tpu.core_type<tc>, window_params = [{pipeline_mode = #tpu.pipeline_mode<synchronous>, transform_indices = @transform_0, window_bounds = array<i64: 128, 128>}, {pipeline_mode = #tpu.pipeline_mode<synchronous>, transform_indices = @transform_1, window_bounds = array<i64: 128, 128>}, {pipeline_mode = #tpu.pipeline_mode<synchronous>, transform_indices = @transform_2, window_bounds = array<i64: 128, 128>}, {pipeline_mode = #tpu.pipeline_mode<synchronous>, transform_indices = @transform_3, window_bounds = array<i64: 1, 128>}, {pipeline_mode = #tpu.pipeline_mode<synchronous>, transform_indices = @transform_4, window_bounds = array<i64: 128, 128>}, {pipeline_mode = #tpu.pipeline_mode<synchronous>, transform_indices = @transform_5, window_bounds = array<i64: 1, 128>}, {pipeline_mode = #tpu.pipeline_mode<synchronous>, transform_indices = @transform_6, window_bounds = array<i64: 128, 128>}]} {
    %c0 = arith.constant 0 : index
    %c0_0 = arith.constant 0 : index
    %0 = vector.load %arg1[%c0, %c0_0] : memref<128x128xbf16, #tpu.memory_space<vmem>>, vector<128x128xbf16>
    %c0_1 = arith.constant 0 : index
    %c0_2 = arith.constant 0 : index
    %1 = vector.load %arg2[%c0_1, %c0_2] : memref<128x128xbf16, #tpu.memory_space<vmem>>, vector<128x128xbf16>
    %c0_3 = arith.constant 0 : index
    %c0_4 = arith.constant 0 : index
    %2 = vector.load %arg3[%c0_3, %c0_4] : memref<128x128xbf16, #tpu.memory_space<vmem>>, vector<128x128xbf16>
    %cst = arith.constant dense<0.000000e+00> : vector<128x128xf32>
    %3 = tpu.matmul %1, %2, %cst {dimension_numbers = #tpu.dot_dimension_numbers<[1], [0], [0], [1], [0, 0, 1, 1], [], []>} : vector<128x128xbf16>, vector<128x128xbf16>, vector<128x128xf32> -> vector<128x128xf32>
    %4 = arith.truncf %3 : vector<128x128xf32> to vector<128x128xbf16>
    %cst_5 = arith.constant dense<0.000000e+00> : vector<128x128xf32>
    %5 = tpu.matmul %0, %4, %cst_5 {dimension_numbers = #tpu.dot_dimension_numbers<[1], [0], [0], [1], [0, 0, 1, 1], [], []>} : vector<128x128xbf16>, vector<128x128xbf16>, vector<128x128xf32> -> vector<128x128xf32>
    %c0_6 = arith.constant 0 : index
    %c0_7 = arith.constant 0 : index
    %6 = vector.load %arg4[%c0_6, %c0_7] : memref<1x128xf32, #tpu.memory_space<vmem>>, vector<1x128xf32>
    %7 = vector.broadcast %6 : vector<1x128xf32> to vector<128x128xf32>
    %8 = arith.addf %5, %7 : vector<128x128xf32>
    %cst_8 = arith.constant 0.000000e+00 : f32
    %9 = vector.broadcast %cst_8 : f32 to vector<128x128xf32>
    %10 = arith.maximumf %8, %9 : vector<128x128xf32>
    %11 = arith.truncf %10 : vector<128x128xf32> to vector<128x128xbf16>
    %c0_9 = arith.constant 0 : index
    %c0_10 = arith.constant 0 : index
    %12 = vector.load %arg5[%c0_9, %c0_10] : memref<128x128xbf16, #tpu.memory_space<vmem>>, vector<128x128xbf16>
    %cst_11 = arith.constant dense<0.000000e+00> : vector<128x128xf32>
    %13 = tpu.matmul %11, %12, %cst_11 {dimension_numbers = #tpu.dot_dimension_numbers<[1], [0], [0], [1], [0, 0, 1, 1], [], []>} : vector<128x128xbf16>, vector<128x128xbf16>, vector<128x128xf32> -> vector<128x128xf32>
    %14 = arith.truncf %13 : vector<128x128xf32> to vector<128x128xbf16>
    %cst_12 = arith.constant dense<0.000000e+00> : vector<128x128xf32>
    %15 = tpu.matmul %0, %14, %cst_12 {dimension_numbers = #tpu.dot_dimension_numbers<[1], [0], [0], [1], [0, 0, 1, 1], [], []>} : vector<128x128xbf16>, vector<128x128xbf16>, vector<128x128xf32> -> vector<128x128xf32>
    %c0_13 = arith.constant 0 : index
    %c0_14 = arith.constant 0 : index
    %16 = vector.load %arg6[%c0_13, %c0_14] : memref<1x128xf32, #tpu.memory_space<vmem>>, vector<1x128xf32>
    %17 = vector.broadcast %16 : vector<1x128xf32> to vector<128x128xf32>
    %18 = arith.addf %15, %17 : vector<128x128xf32>
    %c0_15 = arith.constant 0 : index
    %c0_16 = arith.constant 0 : index
    %19 = vector.load %arg7[%c0_15, %c0_16] : memref<128x128xf32, #tpu.memory_space<vmem>>, vector<128x128xf32>
    tpu.vector_store %arg7[%c0_15, %c0_16], %18 {strides = array<i32>} : memref<128x128xf32, #tpu.memory_space<vmem>>, vector<128x128xf32>,
    return
  }
  func.func @transform_0(%arg0: i32) -> (i32, i32) {
    %c0_i32 = arith.constant 0 : i32
    %c0_i32_0 = arith.constant 0 : i32
    %c0_i32_1 = arith.constant 0 : i32
    return %c0_i32, %c0_i32_0 : i32, i32
  }
  func.func @transform_1(%arg0: i32) -> (i32, i32) {
    %c0_i32 = arith.constant 0 : i32
    %c0_i32_0 = arith.constant 0 : i32
    %c0_i32_1 = arith.constant 0 : i32
    return %c0_i32, %c0_i32_0 : i32, i32
  }
  func.func @transform_2(%arg0: i32) -> (i32, i32) {
    %c0_i32 = arith.constant 0 : i32
    %c0_i32_0 = arith.constant 0 : i32
    %c0_i32_1 = arith.constant 0 : i32
    return %c0_i32, %c0_i32_0 : i32, i32
  }
  func.func @transform_3(%arg0: i32) -> (i32, i32) {
    %c0_i32 = arith.constant 0 : i32
    %c0_i32_0 = arith.constant 0 : i32
    %c0_i32_1 = arith.constant 0 : i32
    return %c0_i32, %c0_i32_0 : i32, i32
  }
  func.func @transform_4(%arg0: i32) -> (i32, i32) {
    %c0_i32 = arith.constant 0 : i32
    %c0_i32_0 = arith.constant 0 : i32
    %c0_i32_1 = arith.constant 0 : i32
    return %c0_i32, %c0_i32_0 : i32, i32
  }
  func.func @transform_5(%arg0: i32) -> (i32, i32) {
    %c0_i32 = arith.constant 0 : i32
    %c0_i32_0 = arith.constant 0 : i32
    %c0_i32_1 = arith.constant 0 : i32
    return %c0_i32, %c0_i32_0 : i32, i32
  }
  func.func @transform_6(%arg0: i32) -> (i32, i32) {
    %c0_i32 = arith.constant 0 : i32
    %c0_i32_0 = arith.constant 0 : i32
    %c0_i32_1 = arith.constant 0 : i32
    return %c0_i32, %c0_i32_0 : i32, i32
  }
}

</mosaic_0001>

<bundles_post_ra>
// kernel: gcn_forward_fused.1
= control target key start
LH: loop header
LB: loop body
LE: loop exit
PB: predicated region body
PF: predicated region fallthrough
CT: control target
= control target key end

     0   :  { %s922_s2 = inlined_call_operand.vmem [shape: bf16[128,128], index: 2, kind: input, shape index: {}]   ;;  %s923_s1 = inlined_call_operand.vmem [shape: bf16[128,128], index: 1, kind: input, shape index: {}]   ;;  %s924_s3 = inlined_call_operand.vmem [shape: f32[1,128], index: 3, kind: input, shape index: {}]   ;;  %s925_s0 = inlined_call_operand.vmem [shape: bf16[128,128], index: 0, kind: input, shape index: {}]   ;;  %s926_s4 = inlined_call_operand.vmem [shape: bf16[128,128], index: 4, kind: input, shape index: {}]   ;;  %s927_s5 = inlined_call_operand.vmem [shape: f32[1,128], index: 5, kind: input, shape index: {}]   ;;  %s928_s6 = inlined_call_operand.vmem [shape: f32[128,128], index: 6, kind: output, shape index: {}]  }
   0x1   :  { %v694_v0 = vld [vmem:[%s922_s2 + $0x38] sm:$0xff]  ;;  %v693_v1 = vld [vmem:[%s922_s2 + $0x30] sm:$0xff]  ;;  %v692_v2 = vld [vmem:[%s922_s2 + $0x28] sm:$0xff] }
   0x2   :  { %167 = vmatpush.bf16.msra.mxu0 %v694_v0  ;;  %v691_v3 = vld [vmem:[%s922_s2 + $0x20] sm:$0xff]  ;;  %v690_v4 = vld [vmem:[%s922_s2 + $0x18] sm:$0xff]  ;;  %v689_v5 = vld [vmem:[%s922_s2 + $0x10] sm:$0xff] }
   0x3   :  { %v688_v6 = vld [vmem:[%s922_s2 + $0x8] sm:$0xff]  ;;  %v687_v7 = vld [vmem:[%s922_s2] sm:$0xff]  ;;  %v681_v10 = vld [vmem:[%s923_s1 + $0x10] sm:$0xff] }
   0x4   :  { %v679_v8 = vld [vmem:[%s923_s1] sm:$0xff]  ;;  %v680_v9 = vld [vmem:[%s923_s1 + $0x8] sm:$0xff]  ;;  %v682_v11 = vld [vmem:[%s923_s1 + $0x18] sm:$0xff] }
   0x5   :  { %v683_v12 = vld [vmem:[%s923_s1 + $0x20] sm:$0xff]  ;;  %v684_v13 = vld [vmem:[%s923_s1 + $0x28] sm:$0xff]  ;;  %v685_v14 = vld [vmem:[%s923_s1 + $0x30] sm:$0xff] }
   0x6   :  { %168 = vmatpush.bf16.msra.mxu0 %v693_v1  ;;  %v686_v15 = vld [vmem:[%s923_s1 + $0x38] sm:$0xff]  ;;  %v791_v40 = vld [vmem:[%s925_s0] sm:$0xff]  ;;  %v797_v41 = vld [vmem:[%s925_s0 + $0x8] sm:$0xff] }
   0x7   :  { %v803_v42 = vld [vmem:[%s925_s0 + $0x10] sm:$0xff]  ;;  %v809_v43 = vld [vmem:[%s925_s0 + $0x18] sm:$0xff]  ;;  %v815_v44 = vld [vmem:[%s925_s0 + $0x20] sm:$0xff] }
   0x8   :  { %v702_v45 = vld [vmem:[%s926_s4 + $0x38] sm:$0xff]  ;;  %v824_v46 = vld [vmem:[%s925_s0 + $0x28] sm:$0xff]  ;;  %v701_v47 = vld [vmem:[%s926_s4 + $0x30] sm:$0xff] }
   0x9   :  { %413 = vmatpush.bf16.msra.mxu2 %v702_v45  ;;  %v700_v48 = vld [vmem:[%s926_s4 + $0x28] sm:$0xff]  ;;  %v699_v49 = vld [vmem:[%s926_s4 + $0x20] sm:$0xff]  ;;  %v698_v50 = vld [vmem:[%s926_s4 + $0x18] sm:$0xff] }
   0xa   :  { %169 = vmatpush.bf16.msra.mxu0 %v692_v2  ;;  %v842_v51 = vld [vmem:[%s925_s0 + $0x30] sm:$0xff]  ;;  %v696_v53 = vld [vmem:[%s926_s4 + $0x8] sm:$0xff]  ;;  %v695_v54 = vld [vmem:[%s926_s4] sm:$0xff] }
   0xb   :  { %v697_v52 = vld [vmem:[%s926_s4 + $0x10] sm:$0xff]  ;;  %v857_v55 = vld [vmem:[%s925_s0 + $0x38] sm:$0xff]  ;;  %v703_v57 = vld [vmem:[%s924_s3] ss:$0 sm:$0xff] }
   0xd   :  { %414 = vmatpush.bf16.msra.mxu2 %v701_v47 }
   0xe   :  { %170 = vmatpush.bf16.msra.mxu0 %v691_v3 }
  0x11   :  { %415 = vmatpush.bf16.msra.mxu2 %v700_v48 }
  0x12   :  { %171 = vmatpush.bf16.msra.mxu0 %v690_v4 }
  0x15   :  { %416 = vmatpush.bf16.msra.mxu2 %v699_v49 }
  0x16   :  { %172 = vmatpush.bf16.msra.mxu0 %v689_v5 }
  0x19   :  { %417 = vmatpush.bf16.msra.mxu2 %v698_v50 }
  0x1a   :  { %173 = vmatpush.bf16.msra.mxu0 %v688_v6 }
  0x1d   :  { %418 = vmatpush.bf16.msra.mxu2 %v697_v52 }
  0x1e   :  { %174 = vmatpush.bf16.msra.mxu0 %v687_v7 }
  0x21   :  { %175 = vmatmul.bf16.vlgmr.msra.gmra.mxu0 %v679_v8  ;;  %419 = vmatpush.bf16.msra.mxu2 %v696_v53 }
  0x25   :  { %420 = vmatpush.bf16.msra.mxu2 %v695_v54 }
  0x31   :  { %180 = vmatmul.bf16.gmra.mxu0 %v680_v9 }
  0x41   :  { %185 = vmatmul.bf16.gmra.mxu0 %v681_v10 }
  0x51   :  { %190 = vmatmul.bf16.gmra.mxu0 %v682_v11 }
  0x61   :  { %195 = vmatmul.bf16.gmra.mxu0 %v683_v12 }
  0x71   :  { %200 = vmatmul.bf16.gmra.mxu0 %v684_v13 }
  0x81   :  { %205 = vmatmul.bf16.gmra.mxu0 %v685_v14 }
  0x91   :  { %210 = vmatmul.bf16.gmra.mxu0 %v686_v15 }
  0x9e   :  { %v176_v16 = vpop.f32.mrf.mxu0 }
  0xa6   :  { %v178_v17 = vpop.f32.mrf.mxu0 }
  0xa7   :  { %v216_v18 = vpack.c.bf16 %v178_v17, %v176_v16 }
  0xae   :  { %v181_v19 = vpop.f32.mrf.mxu0 }
  0xb6   :  { %v183_v20 = vpop.f32.mrf.mxu0 }
  0xb7   :  { %v217_v21 = vpack.c.bf16 %v183_v20, %v181_v19 }
  0xbe   :  { %v186_v22 = vpop.f32.mrf.mxu0 }
  0xc6   :  { %v188_v23 = vpop.f32.mrf.mxu0 }
  0xc7   :  { %v218_v24 = vpack.c.bf16 %v188_v23, %v186_v22 }
  0xce   :  { %v191_v25 = vpop.f32.mrf.mxu0 }
  0xd6   :  { %v193_v26 = vpop.f32.mrf.mxu0 }
  0xd7   :  { %v219_v27 = vpack.c.bf16 %v193_v26, %v191_v25 }
  0xde   :  { %v196_v28 = vpop.f32.mrf.mxu0 }
  0xe6   :  { %v198_v29 = vpop.f32.mrf.mxu0 }
  0xe7   :  { %v220_v39 = vpack.c.bf16 %v198_v29, %v196_v28 }
  0xee   :  { %v201_v30 = vpop.f32.mrf.mxu0 }
  0xf6   :  { %v203_v31 = vpop.f32.mrf.mxu0 }
  0xf7   :  { %v221_v38 = vpack.c.bf16 %v203_v31, %v201_v30 }
  0xfe   :  { %v206_v32 = vpop.f32.mrf.mxu0 }
 0x106   :  { %v208_v33 = vpop.f32.mrf.mxu0 }
 0x107   :  { %v222_v37 = vpack.c.bf16 %v208_v33, %v206_v32 }
 0x10e   :  { %v211_v34 = vpop.f32.mrf.mxu0 }
 0x116   :  { %v213_v35 = vpop.f32.mrf.mxu0 }
 0x117   :  { %v223_v36 = vpack.c.bf16 %v213_v35, %v211_v34 }
 0x119   :  { %276 = vmatpush.bf16.msra.mxu1 %v223_v36 }
 0x11d   :  { %277 = vmatpush.bf16.msra.mxu1 %v222_v37 }
 0x121   :  { %278 = vmatpush.bf16.msra.mxu1 %v221_v38 }
 0x125   :  { %279 = vmatpush.bf16.msra.mxu1 %v220_v39 }
 0x129   :  { %280 = vmatpush.bf16.msra.mxu1 %v219_v27 }
 0x12d   :  { %281 = vmatpush.bf16.msra.mxu1 %v218_v24 }
 0x131   :  { %282 = vmatpush.bf16.msra.mxu1 %v217_v21 }
 0x135   :  { %283 = vmatpush.bf16.msra.mxu1 %v216_v18 }
 0x138   :  { %284 = vmatmul.bf16.vlgmr.msra.gmra.mxu1 %v791_v40 }
 0x148   :  { %289 = vmatmul.bf16.gmra.mxu1 %v797_v41 }
 0x158   :  { %294 = vmatmul.bf16.gmra.mxu1 %v803_v42 }
 0x168   :  { %299 = vmatmul.bf16.gmra.mxu1 %v809_v43 }
 0x178   :  { %304 = vmatmul.bf16.gmra.mxu1 %v815_v44 }
 0x188   :  { %309 = vmatmul.bf16.gmra.mxu1 %v824_v46 }
 0x198   :  { %314 = vmatmul.bf16.gmra.mxu1 %v842_v51 }
 0x1a8   :  { %319 = vmatmul.bf16.gmra.mxu1 %v857_v55 }
 0x1b5   :  { %v285_v56 = vpop.f32.mrf.mxu1 }
 0x1b6   :  { %v286_v58 = vadd.f32 %v703_v57, %v285_v56 }
 0x1b8   :  { %v325_v61 = vmax.f32 %v286_v58, 0.0 }
 0x1bd   :  { %v287_v59 = vpop.f32.mrf.mxu1 }
 0x1be   :  { %v288_v60 = vadd.f32 %v703_v57, %v287_v59 }
 0x1c0   :  { %v326_v62 = vmax.f32 %v288_v60, 0.0 }
 0x1c2   :  { %v341_v63 = vpack.c.bf16 %v326_v62, %v325_v61 }
 0x1c4   :  { %421 = vmatmul.bf16.vlgmr.msra.gmra.mxu2 %v341_v63 }
 0x1c5   :  { %v290_v0 = vpop.f32.mrf.mxu1 }
 0x1c6   :  { %v291_v1 = vadd.f32 %v703_v57, %v290_v0 }
 0x1c8   :  { %v327_v4 = vmax.f32 %v291_v1, 0.0 }
 0x1cd   :  { %v292_v2 = vpop.f32.mrf.mxu1 }
 0x1ce   :  { %v293_v3 = vadd.f32 %v703_v57, %v292_v2 }
 0x1d0   :  { %v328_v5 = vmax.f32 %v293_v3, 0.0 }
 0x1d2   :  { %v342_v6 = vpack.c.bf16 %v328_v5, %v327_v4 }
 0x1d4   :  { %426 = vmatmul.bf16.gmra.mxu2 %v342_v6 }
 0x1d5   :  { %v295_v7 = vpop.f32.mrf.mxu1 }
 0x1d6   :  { %v296_v8 = vadd.f32 %v703_v57, %v295_v7 }
 0x1d8   :  { %v329_v11 = vmax.f32 %v296_v8, 0.0 }
 0x1dd   :  { %v297_v9 = vpop.f32.mrf.mxu1 }
 0x1de   :  { %v298_v10 = vadd.f32 %v703_v57, %v297_v9 }
 0x1e0   :  { %v330_v12 = vmax.f32 %v298_v10, 0.0 }
 0x1e2   :  { %v343_v13 = vpack.c.bf16 %v330_v12, %v329_v11 }
 0x1e4   :  { %431 = vmatmul.bf16.gmra.mxu2 %v343_v13 }
 0x1e5   :  { %v300_v14 = vpop.f32.mrf.mxu1 }
 0x1e6   :  { %v301_v15 = vadd.f32 %v703_v57, %v300_v14 }
 0x1e8   :  { %v331_v18 = vmax.f32 %v301_v15, 0.0 }
 0x1ed   :  { %v302_v16 = vpop.f32.mrf.mxu1 }
 0x1ee   :  { %v303_v17 = vadd.f32 %v703_v57, %v302_v16 }
 0x1f0   :  { %v332_v19 = vmax.f32 %v303_v17, 0.0  ;;  %v704_v17 = vld [vmem:[%s927_s5] ss:$0 sm:$0xff] }
 0x1f2   :  { %v344_v20 = vpack.c.bf16 %v332_v19, %v331_v18 }
 0x1f4   :  { %436 = vmatmul.bf16.gmra.mxu2 %v344_v20 }
 0x1f5   :  { %v305_v21 = vpop.f32.mrf.mxu1 }
 0x1f6   :  { %v306_v22 = vadd.f32 %v703_v57, %v305_v21 }
 0x1f8   :  { %v333_v25 = vmax.f32 %v306_v22, 0.0 }
 0x1fd   :  { %v307_v23 = vpop.f32.mrf.mxu1 }
 0x1fe   :  { %v308_v24 = vadd.f32 %v703_v57, %v307_v23 }
 0x200   :  { %v334_v26 = vmax.f32 %v308_v24, 0.0 }
 0x202   :  { %v345_v27 = vpack.c.bf16 %v334_v26, %v333_v25 }
 0x204   :  { %441 = vmatmul.bf16.gmra.mxu2 %v345_v27 }
 0x205   :  { %v310_v28 = vpop.f32.mrf.mxu1 }
 0x206   :  { %v311_v29 = vadd.f32 %v703_v57, %v310_v28 }
 0x208   :  { %v335_v32 = vmax.f32 %v311_v29, 0.0 }
 0x20d   :  { %v312_v30 = vpop.f32.mrf.mxu1 }
 0x20e   :  { %v313_v31 = vadd.f32 %v703_v57, %v312_v30 }
 0x210   :  { %v336_v33 = vmax.f32 %v313_v31, 0.0 }
 0x212   :  { %v346_v34 = vpack.c.bf16 %v336_v33, %v335_v32 }
 0x214   :  { %446 = vmatmul.bf16.gmra.mxu2 %v346_v34 }
 0x215   :  { %v315_v35 = vpop.f32.mrf.mxu1 }
 0x216   :  { %v316_v36 = vadd.f32 %v703_v57, %v315_v35 }
 0x218   :  { %v337_v39 = vmax.f32 %v316_v36, 0.0 }
 0x21d   :  { %v317_v37 = vpop.f32.mrf.mxu1 }
 0x21e   :  { %v318_v38 = vadd.f32 %v703_v57, %v317_v37 }
 0x220   :  { %v338_v45 = vmax.f32 %v318_v38, 0.0 }
 0x222   :  { %v347_v47 = vpack.c.bf16 %v338_v45, %v337_v39 }
 0x224   :  { %451 = vmatmul.bf16.gmra.mxu2 %v347_v47 }
 0x225   :  { %v320_v48 = vpop.f32.mrf.mxu1 }
 0x226   :  { %v321_v49 = vadd.f32 %v703_v57, %v320_v48 }
 0x228   :  { %v339_v53 = vmax.f32 %v321_v49, 0.0 }
 0x22d   :  { %v322_v50 = vpop.f32.mrf.mxu1 }
 0x22e   :  { %v323_v52 = vadd.f32 %v703_v57, %v322_v50 }
 0x230   :  { %v340_v54 = vmax.f32 %v323_v52, 0.0 }
 0x232   :  { %v348_v56 = vpack.c.bf16 %v340_v54, %v339_v53 }
 0x234   :  { %456 = vmatmul.bf16.gmra.mxu2 %v348_v56 }
 0x247   :  { %v422_v58 = vpop.f32.mrf.mxu2 }
 0x24f   :  { %v424_v59 = vpop.f32.mrf.mxu2 }
 0x250   :  { %v462_v60 = vpack.c.bf16 %v424_v59, %v422_v58 }
 0x257   :  { %v427_v61 = vpop.f32.mrf.mxu2 }
 0x25f   :  { %v429_v62 = vpop.f32.mrf.mxu2 }
 0x260   :  { %v463_v63 = vpack.c.bf16 %v429_v62, %v427_v61 }
 0x267   :  { %v432_v0 = vpop.f32.mrf.mxu2 }
 0x26f   :  { %v434_v1 = vpop.f32.mrf.mxu2 }
 0x270   :  { %v464_v2 = vpack.c.bf16 %v434_v1, %v432_v0 }
 0x277   :  { %v437_v3 = vpop.f32.mrf.mxu2 }
 0x27f   :  { %v439_v4 = vpop.f32.mrf.mxu2 }
 0x280   :  { %v465_v5 = vpack.c.bf16 %v439_v4, %v437_v3 }
 0x287   :  { %v442_v6 = vpop.f32.mrf.mxu2 }
 0x28f   :  { %v444_v7 = vpop.f32.mrf.mxu2 }
 0x290   :  { %v466_v16 = vpack.c.bf16 %v444_v7, %v442_v6 }
 0x297   :  { %v447_v8 = vpop.f32.mrf.mxu2 }
 0x29f   :  { %v449_v57 = vpop.f32.mrf.mxu2 }
 0x2a0   :  { %v467_v15 = vpack.c.bf16 %v449_v57, %v447_v8 }
 0x2a7   :  { %v452_v9 = vpop.f32.mrf.mxu2 }
 0x2af   :  { %v454_v10 = vpop.f32.mrf.mxu2 }
 0x2b0   :  { %v468_v14 = vpack.c.bf16 %v454_v10, %v452_v9 }
 0x2b7   :  { %v457_v11 = vpop.f32.mrf.mxu2 }
 0x2bf   :  { %v459_v12 = vpop.f32.mrf.mxu2 }
 0x2c0   :  { %v469_v13 = vpack.c.bf16 %v459_v12, %v457_v11 }
 0x2c2   :  { %474 = vmatpush.bf16.msra.mxu3 %v469_v13 }
 0x2c6   :  { %475 = vmatpush.bf16.msra.mxu3 %v468_v14 }
 0x2ca   :  { %476 = vmatpush.bf16.msra.mxu3 %v467_v15 }
 0x2ce   :  { %477 = vmatpush.bf16.msra.mxu3 %v466_v16 }
 0x2d2   :  { %478 = vmatpush.bf16.msra.mxu3 %v465_v5 }
 0x2d6   :  { %479 = vmatpush.bf16.msra.mxu3 %v464_v2 }
 0x2da   :  { %480 = vmatpush.bf16.msra.mxu3 %v463_v63 }
 0x2de   :  { %481 = vmatpush.bf16.msra.mxu3 %v462_v60 }
 0x2e1   :  { %482 = vmatmul.bf16.vlgmr.msra.gmra.mxu3 %v791_v40 }
 0x2f1   :  { %487 = vmatmul.bf16.gmra.mxu3 %v797_v41 }
 0x301   :  { %492 = vmatmul.bf16.gmra.mxu3 %v803_v42 }
 0x311   :  { %497 = vmatmul.bf16.gmra.mxu3 %v809_v43 }
 0x321   :  { %502 = vmatmul.bf16.gmra.mxu3 %v815_v44 }
 0x331   :  { %507 = vmatmul.bf16.gmra.mxu3 %v824_v46 }
 0x341   :  { %512 = vmatmul.bf16.gmra.mxu3 %v842_v51 }
 0x351   :  { %517 = vmatmul.bf16.gmra.mxu3 %v857_v55 }
 0x364   :  { %v483_v18 = vpop.f32.mrf.mxu3 }
 0x365   :  { %v484_v40 = vadd.f32 %v704_v17, %v483_v18 }
 0x367   :  { %523 = vst [vmem:[%s928_s6] sm:$0xff] %v484_v40 }
 0x36c   :  { %v485_v41 = vpop.f32.mrf.mxu3 }
 0x36d   :  { %v486_v42 = vadd.f32 %v704_v17, %v485_v41 }
 0x36f   :  { %524 = vst [vmem:[%s928_s6 + $0x8] sm:$0xff] %v486_v42 }
 0x374   :  { %v488_v43 = vpop.f32.mrf.mxu3 }
 0x375   :  { %v489_v44 = vadd.f32 %v704_v17, %v488_v43 }
 0x377   :  { %525 = vst [vmem:[%s928_s6 + $0x10] sm:$0xff] %v489_v44 }
 0x37c   :  { %v490_v46 = vpop.f32.mrf.mxu3 }
 0x37d   :  { %v491_v51 = vadd.f32 %v704_v17, %v490_v46 }
 0x37f   :  { %526 = vst [vmem:[%s928_s6 + $0x18] sm:$0xff] %v491_v51 }
 0x384   :  { %v493_v55 = vpop.f32.mrf.mxu3 }
 0x385   :  { %v494_v19 = vadd.f32 %v704_v17, %v493_v55 }
 0x387   :  { %527 = vst [vmem:[%s928_s6 + $0x20] sm:$0xff] %v494_v19 }
 0x38c   :  { %v495_v20 = vpop.f32.mrf.mxu3 }
 0x38d   :  { %v496_v21 = vadd.f32 %v704_v17, %v495_v20 }
 0x38f   :  { %528 = vst [vmem:[%s928_s6 + $0x28] sm:$0xff] %v496_v21 }
 0x394   :  { %v498_v22 = vpop.f32.mrf.mxu3 }
 0x395   :  { %v499_v23 = vadd.f32 %v704_v17, %v498_v22 }
 0x397   :  { %529 = vst [vmem:[%s928_s6 + $0x30] sm:$0xff] %v499_v23 }
 0x39c   :  { %v500_v24 = vpop.f32.mrf.mxu3 }
 0x39d   :  { %v501_v25 = vadd.f32 %v704_v17, %v500_v24 }
 0x39f   :  { %530 = vst [vmem:[%s928_s6 + $0x38] sm:$0xff] %v501_v25 }
 0x3a4   :  { %v503_v26 = vpop.f32.mrf.mxu3 }
 0x3a5   :  { %v504_v27 = vadd.f32 %v704_v17, %v503_v26 }
 0x3a7   :  { %531 = vst [vmem:[%s928_s6 + $0x40] sm:$0xff] %v504_v27 }
 0x3ac   :  { %v505_v28 = vpop.f32.mrf.mxu3 }
 0x3ad   :  { %v506_v29 = vadd.f32 %v704_v17, %v505_v28 }
 0x3af   :  { %532 = vst [vmem:[%s928_s6 + $0x48] sm:$0xff] %v506_v29 }
 0x3b4   :  { %v508_v30 = vpop.f32.mrf.mxu3 }
 0x3b5   :  { %v509_v31 = vadd.f32 %v704_v17, %v508_v30 }
 0x3b7   :  { %533 = vst [vmem:[%s928_s6 + $0x50] sm:$0xff] %v509_v31 }
 0x3bc   :  { %v510_v32 = vpop.f32.mrf.mxu3 }
 0x3bd   :  { %v511_v33 = vadd.f32 %v704_v17, %v510_v32 }
 0x3bf   :  { %534 = vst [vmem:[%s928_s6 + $0x58] sm:$0xff] %v511_v33 }
 0x3c4   :  { %v513_v34 = vpop.f32.mrf.mxu3 }
 0x3c5   :  { %v514_v35 = vadd.f32 %v704_v17, %v513_v34 }
 0x3c7   :  { %535 = vst [vmem:[%s928_s6 + $0x60] sm:$0xff] %v514_v35 }
 0x3cc   :  { %v515_v36 = vpop.f32.mrf.mxu3 }
 0x3cd   :  { %v516_v37 = vadd.f32 %v704_v17, %v515_v36 }
 0x3cf   :  { %536 = vst [vmem:[%s928_s6 + $0x68] sm:$0xff] %v516_v37 }
 0x3d4   :  { %v518_v38 = vpop.f32.mrf.mxu3 }
 0x3d5   :  { %v519_v39 = vadd.f32 %v704_v17, %v518_v38 }
 0x3d7   :  { %537 = vst [vmem:[%s928_s6 + $0x70] sm:$0xff] %v519_v39 }
 0x3dc   :  { %v520_v45 = vpop.f32.mrf.mxu3 }
 0x3dd   :  { %v521_v47 = vadd.f32 %v704_v17, %v520_v45 }
 0x3df   :  { %538 = vst [vmem:[%s928_s6 + $0x78] sm:$0xff] %v521_v47 }

</bundles_post_ra>
